<compile_context>
chip_gen: v5e
topology: v5e:2x2
jax: 0.10.0
libtpu: 0.0.40
codegen_flags: <defaults>
</compile_context>

<pallas_src>
from functools import partial

import jax
import jax.numpy as jnp
from jax import lax
from jax.experimental import pallas as pl
from jax.experimental.pallas import tpu as pltpu

_SUBLANE = 8
_LANE = 128


def _round_up(x, m):
    return ((x + m - 1) // m) * m


def _round_down(x, m):
    return max((x // m) * m, m)


def _vmem_capacity_bytes():
    """Physical VMEM per core; conservative (v7x) fallback if the query fails."""
    try:
        return int(pltpu.get_tpu_info().vmem_capacity_bytes)
    except Exception:
        return 64 * 1024 * 1024


def _plan_tiles(rows, B, D, H_pad, P, in_bytes, out_bytes, w_bytes, tm_requested):
    """Pick (row_tile, compute_chunk, vmem_limit_bytes) from a VMEM budget."""
    cap = _vmem_capacity_bytes()
    vmem_limit = min(cap * 3 // 4, 100 * 1024 * 1024)   # ~48 MiB on v7x, 96 MiB on v5e/v6e

    # Resident weights (budgeted as double-buffered even if Buffered(1) sticks).
    weight_bytes = 2 * ((D * H_pad + H_pad * P) * w_bytes + (H_pad + P) * 4)
    # f32 intermediates for one compute chunk (h and z), with slack for vregs.
    chunk_cap = 512
    scratch_bytes = 2 * chunk_cap * (H_pad + P) * 4
    budget = int(vmem_limit * 0.85) - weight_bytes - scratch_bytes
    per_row = 2 * D * in_bytes + 2 * P * out_bytes      # double-buffered x + out streams
    tile_vmem_max = max(budget // per_row, _SUBLANE)

    tile = tile_vmem_max if tm_requested is None else min(tm_requested, tile_vmem_max)
    tile = min(tile, _round_up(rows, _SUBLANE))
    if B == 1 and rows >= 64:
        # Keep >= 2 grid steps so both v7x TensorCores get work on single-batch calls.
        tile = min(tile, _round_up(-(-rows // 2), _SUBLANE))

    # Round so MXU passes fill and the compute chunk divides the tile.
    if tile >= 1024:
        tile = _round_down(tile, 512)
    elif tile >= 512:
        tile = _round_down(tile, 256)
    elif tile >= _LANE:
        tile = _round_down(tile, _LANE)
    else:
        tile = _round_up(max(tile, _SUBLANE), _SUBLANE)

    # In-kernel compute sub-chunk (decouple DMA tile from compute tile).
    if tile % 512 == 0 and tile > 512:
        chunk = 512
    elif tile % 256 == 0 and tile > 256:
        chunk = 256
    else:
        chunk = tile
    return tile, chunk, int(vmem_limit)


def prepare_graph_decoder_params(w1, b1, w2, b2, wt, bt,
                                 compute_dtype=jnp.bfloat16, lane_pad=_LANE):
    """One-time preprocessing (hoisted out of the per-call path).

    PyTorch nn.Linear layouts: w1:(H,D) b1:(H,), w2:(O,H) b2:(O,),
    wt:(t_prime, input_dim) bt:(t_prime,).  mlp2 and time_projection are fused
    (both linear): W_fused = W2^T @ Wt^T, b_fused = b2 @ Wt^T + bt.  H is padded
    to a lane multiple; biases stay f32 (added to the f32 MXU accumulators)."""
    w1 = jnp.asarray(w1, jnp.float32)   # (H, D)
    b1 = jnp.asarray(b1, jnp.float32)   # (H,)
    w2 = jnp.asarray(w2, jnp.float32)   # (O, H)
    b2 = jnp.asarray(b2, jnp.float32)   # (O,)
    wt = jnp.asarray(wt, jnp.float32)   # (P, O)   (module only works when O == input_dim)
    bt = jnp.asarray(bt, jnp.float32)   # (P,)

    H, D = w1.shape
    O = w2.shape[0]
    if wt.shape[1] != O:
        raise ValueError("GraphDecoder requires mlp2 output_dim == time_projection input_dim")

    w_fused = w2.T @ wt.T               # (H, P)  exact algebraic fusion
    b_fused = b2 @ wt.T + bt            # (P,)

    H_pad = _round_up(H, lane_pad)
    w1t = jnp.zeros((D, H_pad), jnp.float32).at[:, :H].set(w1.T)
    b1p = jnp.zeros((1, H_pad), jnp.float32).at[:, :H].set(b1)
    wfp = jnp.zeros((H_pad, wt.shape[0]), jnp.float32).at[:H, :].set(w_fused)

    return dict(
        w1t=w1t.astype(compute_dtype),          # (D, H_pad)
        b1=b1p,                                 # (1, H_pad) f32
        w_fused=wfp.astype(compute_dtype),      # (H_pad, P)
        b_fused=b_fused.reshape(1, -1),         # (1, P)     f32
    )


def _graph_decoder_kernel(x_ref, w1_ref, b1_ref, wf_ref, bf_ref, o_ref, *, chunk):
    # x_ref : (TILE, D)    row tile (rows = flattened (t, n) positions of one batch)
    # w1_ref: (D, H_pad)   mlp1 weight, (in, out)      b1_ref: (1, H_pad) f32
    # wf_ref: (H_pad, P)   fused mlp2@time_projection  bf_ref: (1, P)     f32
    # o_ref : (TILE, P)
    tile = x_ref.shape[0]
    n_chunks = tile // chunk   # static

    def compute(x):
        h = jnp.dot(x, w1_ref[...], preferred_element_type=jnp.float32)
        h = jnp.maximum(h + b1_ref[...], 0.0)                     # relu(mlp1), f32
        z = jnp.dot(h.astype(wf_ref.dtype), wf_ref[...],
                    preferred_element_type=jnp.float32) + bf_ref[...]
        return z.astype(o_ref.dtype)

    if n_chunks == 1:
        o_ref[...] = compute(x_ref[...])
    else:
        def body(c, carry):
            r0 = pl.multiple_of(c * chunk, chunk)
            o_ref[pl.ds(r0, chunk), :] = compute(x_ref[pl.ds(r0, chunk), :])
            return carry
        lax.fori_loop(0, n_chunks, body, 0)


def _const_spec(shape, single_buffer):
    """BlockSpec for a grid-invariant (resident) operand."""
    ndim = len(shape)
    imap = lambda b, i: (0,) * ndim
    if single_buffer:
        return pl.BlockSpec(shape, imap, pipeline_mode=pl.Buffered(1))
    return pl.BlockSpec(shape, imap)


@partial(jax.jit, static_argnames=("t_prime", "tm", "single_buffer_weights"))
def graph_decoder_forward(x, params, *, t_prime, tm=None, single_buffer_weights=True):
    """x: [B, T, N, D]; returns [B, min(t_prime, T), N, t_prime]."""
    B, T, N, D = x.shape
    H_pad = params["w1t"].shape[1]
    P = params["w_fused"].shape[1]

    t_eff = min(t_prime, T)        # the module's trailing x[:, :t_prime] slice
    rows = t_eff * N               # rows actually produced per batch
    x3 = x.reshape(B, T * N, D)    # contiguous -> free (no copy)

    in_bytes = jnp.dtype(x.dtype).itemsize
    w_bytes = jnp.dtype(params["w1t"].dtype).itemsize
    tile, chunk, vmem_limit = _plan_tiles(rows, B, D, H_pad, P,
                                          in_bytes, in_bytes, w_bytes, tm)
    n_row_tiles = pl.cdiv(rows, tile)

    out = pl.pallas_call(
        partial(_graph_decoder_kernel, chunk=chunk),
        out_shape=jax.ShapeDtypeStruct((B, rows, P), x.dtype),
        grid_spec=pltpu.PrefetchScalarGridSpec(
            num_scalar_prefetch=0,
            grid=(B, n_row_tiles),
            in_specs=[
                pl.BlockSpec((None, tile, D), lambda b, i: (b, i, 0)),   # x rows (only first t'*N per batch)
                _const_spec((D, H_pad), single_buffer_weights),          # W1 (resident)
                _const_spec((1, H_pad), single_buffer_weights),          # b1
                _const_spec((H_pad, P), single_buffer_weights),          # W_fused (resident)
                _const_spec((1, P), single_buffer_weights),              # b_fused
            ],
            out_specs=pl.BlockSpec((None, tile, P), lambda b, i: (b, i, 0)),
        ),
        compiler_params=pltpu.CompilerParams(
            dimension_semantics=("parallel", "parallel"),
            vmem_limit_bytes=vmem_limit,
        ),
    )(x3, params["w1t"], params["b1"], params["w_fused"], params["b_fused"])

    return out.reshape(B, t_eff, N, P)   # contiguous -> free


def _reference_forward(x, w1, b1, w2, b2, wt, bt, t_prime):
    """Pure-JAX mirror of the PyTorch GraphDecoder.forward (un-fused, f32)."""
    h = jax.nn.relu(jnp.einsum("btnd,hd->btnh", x, w1) + b1)
    y = jnp.einsum("btnh,oh->btno", h, w2) + b2
    z = jnp.einsum("btno,po->btnp", y, wt) + bt
    return z[:, :t_prime, :, :]


if __name__ == "__main__":
    key = jax.random.PRNGKey(0)

    _SINGLE_BUFFER = [True]

    def _call(x, params, t_prime, tm):
        try:
            out = graph_decoder_forward(x, params, t_prime=t_prime, tm=tm,
                                        single_buffer_weights=_SINGLE_BUFFER[0])
            return jax.block_until_ready(out)
        except Exception:
            if not _SINGLE_BUFFER[0]:
                raise
            # jax version without pipeline_mode=pl.Buffered(1) support: fall back.
            _SINGLE_BUFFER[0] = False
            out = graph_decoder_forward(x, params, t_prime=t_prime, tm=tm,
                                        single_buffer_weights=False)
            return jax.block_until_ready(out)

    def run_case(B, T, N, D, H, t_prime, compute_dtype=jnp.float32, tm=None, tol=1e-4):
        O = D  # GraphDecoder only type-checks when mlp2 output_dim == input_dim
        ks = jax.random.split(key, 7)
        x = jax.random.normal(ks[0], (B, T, N, D), dtype=jnp.float32)
        w1 = jax.random.normal(ks[1], (H, D), dtype=jnp.float32) * 0.1
        b1 = jax.random.normal(ks[2], (H,), dtype=jnp.float32) * 0.1
        w2 = jax.random.normal(ks[3], (O, H), dtype=jnp.float32) * 0.1
        b2 = jax.random.normal(ks[4], (O,), dtype=jnp.float32) * 0.1
        wt = jax.random.normal(ks[5], (t_prime, D), dtype=jnp.float32) * 0.1
        bt = jax.random.normal(ks[6], (t_prime,), dtype=jnp.float32) * 0.1

        params = prepare_graph_decoder_params(w1, b1, w2, b2, wt, bt, compute_dtype)
        out = _call(x.astype(compute_dtype), params, t_prime, tm)

        ref = _reference_forward(x, w1, b1, w2, b2, wt, bt, t_prime)
        assert out.shape == ref.shape, (out.shape, ref.shape)
        err = jnp.max(jnp.abs(out.astype(jnp.float32) - ref))
        assert jnp.allclose(out.astype(jnp.float32), ref, atol=tol, rtol=tol), \
            f"mismatch vs reference (max abs err {err})"

    # 1) small shapes, rows divide the tile exactly, f32
    run_case(B=2, T=8, N=4, D=16, H=32, t_prime=4)
    # 2) non-divisible row tiling: 42 rows/batch, forced tile=8 -> partial last block, f32
    run_case(B=2, T=9, N=7, D=16, H=32, t_prime=6, tm=8)
    # 3) bf16 compute path (the default compute dtype), loose tolerance
    run_case(B=2, T=8, N=4, D=16, H=32, t_prime=4, compute_dtype=jnp.bfloat16, tol=3e-2)
    # 4) B==1 two-way row split + in-kernel 256-row compute chunks + partial edge blocks
    run_case(B=1, T=8, N=130, D=16, H=40, t_prime=8)

    print("KERNEL_OK")
</pallas_src>

<mosaic_0001>
module attributes {stable_mosaic.version = 11 : i64} {
  func.func @_graph_decoder_kernel(%arg0: i32, %arg1: i32, %arg2: memref<1x16x16xf32, #tpu.memory_space<vmem>>, %arg3: memref<16x128xf32, #tpu.memory_space<vmem>>, %arg4: memref<1x128xf32, #tpu.memory_space<vmem>>, %arg5: memref<128x4xf32, #tpu.memory_space<vmem>>, %arg6: memref<1x4xf32, #tpu.memory_space<vmem>>, %arg7: memref<1x16x4xf32, #tpu.memory_space<vmem>>) attributes {dimension_semantics = [#tpu.dimension_semantics<parallel>, #tpu.dimension_semantics<parallel>], iteration_bounds = array<i64: 2, 1>, scalar_prefetch = 0 : i64, scratch_operands = 0 : i64, tpu.core_type = #tpu.core_type<tc>, window_params = [{transform_indices = @transform_0, window_bounds = array<i64: 1, 16, 16>}, {pipeline_mode = #tpu.pipeline_mode<synchronous>, transform_indices = @transform_1, window_bounds = array<i64: 16, 128>}, {pipeline_mode = #tpu.pipeline_mode<synchronous>, transform_indices = @transform_2, window_bounds = array<i64: 1, 128>}, {pipeline_mode = #tpu.pipeline_mode<synchronous>, transform_indices = @transform_3, window_bounds = array<i64: 128, 4>}, {pipeline_mode = #tpu.pipeline_mode<synchronous>, transform_indices = @transform_4, window_bounds = array<i64: 1, 4>}, {transform_indices = @transform_5, window_bounds = array<i64: 1, 16, 4>}]} {
    %c0 = arith.constant 0 : index
    %c0_0 = arith.constant 0 : index
    %c0_1 = arith.constant 0 : index
    %0 = vector.load %arg2[%c0, %c0_0, %c0_1] : memref<1x16x16xf32, #tpu.memory_space<vmem>>, vector<1x16x16xf32>
    %1 = vector.shape_cast %0 : vector<1x16x16xf32> to vector<16x16xf32>
    %c0_2 = arith.constant 0 : index
    %c0_3 = arith.constant 0 : index
    %2 = vector.load %arg3[%c0_2, %c0_3] : memref<16x128xf32, #tpu.memory_space<vmem>>, vector<16x128xf32>
    %cst = arith.constant dense<0.000000e+00> : vector<16x128xf32>
    %3 = tpu.matmul %1, %2, %cst {dimension_numbers = #tpu.dot_dimension_numbers<[1], [0], [0], [1], [0, 0, 1, 1], [], []>} : vector<16x16xf32>, vector<16x128xf32>, vector<16x128xf32> -> vector<16x128xf32>
    %c0_4 = arith.constant 0 : index
    %c0_5 = arith.constant 0 : index
    %4 = vector.load %arg4[%c0_4, %c0_5] : memref<1x128xf32, #tpu.memory_space<vmem>>, vector<1x128xf32>
    %5 = vector.broadcast %4 : vector<1x128xf32> to vector<16x128xf32>
    %6 = arith.addf %3, %5 : vector<16x128xf32>
    %cst_6 = arith.constant 0.000000e+00 : f32
    %7 = vector.broadcast %cst_6 : f32 to vector<16x128xf32>
    %8 = arith.maximumf %6, %7 : vector<16x128xf32>
    %c0_7 = arith.constant 0 : index
    %c0_8 = arith.constant 0 : index
    %9 = vector.load %arg5[%c0_7, %c0_8] : memref<128x4xf32, #tpu.memory_space<vmem>>, vector<128x4xf32>
    %cst_9 = arith.constant dense<0.000000e+00> : vector<16x4xf32>
    %10 = tpu.matmul %8, %9, %cst_9 {dimension_numbers = #tpu.dot_dimension_numbers<[1], [0], [0], [1], [0, 0, 1, 1], [], []>} : vector<16x128xf32>, vector<128x4xf32>, vector<16x4xf32> -> vector<16x4xf32>
    %c0_10 = arith.constant 0 : index
    %c0_11 = arith.constant 0 : index
    %11 = vector.load %arg6[%c0_10, %c0_11] : memref<1x4xf32, #tpu.memory_space<vmem>>, vector<1x4xf32>
    %12 = vector.broadcast %11 : vector<1x4xf32> to vector<16x4xf32>
    %13 = arith.addf %10, %12 : vector<16x4xf32>
    %c0_12 = arith.constant 0 : index
    %c0_13 = arith.constant 0 : index
    %c0_14 = arith.constant 0 : index
    %14 = vector.load %arg7[%c0_12, %c0_13, %c0_14] : memref<1x16x4xf32, #tpu.memory_space<vmem>>, vector<1x16x4xf32>
    %15 = vector.shape_cast %14 : vector<1x16x4xf32> to vector<16x4xf32>
    %16 = vector.shape_cast %13 : vector<16x4xf32> to vector<1x16x4xf32>
    tpu.vector_store %arg7[%c0_12, %c0_13, %c0_14], %16 {strides = array<i32>} : memref<1x16x4xf32, #tpu.memory_space<vmem>>, vector<1x16x4xf32>,
    return
  }
  func.func @transform_0(%arg0: i32, %arg1: i32) -> (i32, i32, i32) {
    %c0_i32 = arith.constant 0 : i32
    %c0_i32_0 = arith.constant 0 : i32
    return %arg0, %arg1, %c0_i32 : i32, i32, i32
  }
  func.func @transform_1(%arg0: i32, %arg1: i32) -> (i32, i32) {
    %c0_i32 = arith.constant 0 : i32
    %c0_i32_0 = arith.constant 0 : i32
    %c0_i32_1 = arith.constant 0 : i32
    return %c0_i32, %c0_i32_0 : i32, i32
  }
  func.func @transform_2(%arg0: i32, %arg1: i32) -> (i32, i32) {
    %c0_i32 = arith.constant 0 : i32
    %c0_i32_0 = arith.constant 0 : i32
    %c0_i32_1 = arith.constant 0 : i32
    return %c0_i32, %c0_i32_0 : i32, i32
  }
  func.func @transform_3(%arg0: i32, %arg1: i32) -> (i32, i32) {
    %c0_i32 = arith.constant 0 : i32
    %c0_i32_0 = arith.constant 0 : i32
    %c0_i32_1 = arith.constant 0 : i32
    return %c0_i32, %c0_i32_0 : i32, i32
  }
  func.func @transform_4(%arg0: i32, %arg1: i32) -> (i32, i32) {
    %c0_i32 = arith.constant 0 : i32
    %c0_i32_0 = arith.constant 0 : i32
    %c0_i32_1 = arith.constant 0 : i32
    return %c0_i32, %c0_i32_0 : i32, i32
  }
  func.func @transform_5(%arg0: i32, %arg1: i32) -> (i32, i32, i32) {
    %c0_i32 = arith.constant 0 : i32
    %c0_i32_0 = arith.constant 0 : i32
    return %arg0, %arg1, %c0_i32 : i32, i32, i32
  }
}

module attributes {stable_mosaic.version = 11 : i64} {
  func.func @_graph_decoder_kernel(%arg0: i32, %arg1: i32, %arg2: memref<1x16x16xf32, #tpu.memory_space<vmem>>, %arg3: memref<16x128xf32, #tpu.memory_space<vmem>>, %arg4: memref<1x128xf32, #tpu.memory_space<vmem>>, %arg5: memref<128x4xf32, #tpu.memory_space<vmem>>, %arg6: memref<1x4xf32, #tpu.memory_space<vmem>>, %arg7: memref<1x16x4xf32, #tpu.memory_space<vmem>>) attributes {dimension_semantics = [#tpu.dimension_semantics<parallel>, #tpu.dimension_semantics<parallel>], iteration_bounds = array<i64: 2, 1>, scalar_prefetch = 0 : i64, scratch_operands = 0 : i64, tpu.core_type = #tpu.core_type<tc>, window_params = [{transform_indices = @transform_0, window_bounds = array<i64: 1, 16, 16>}, {pipeline_mode = #tpu.pipeline_mode<synchronous>, transform_indices = @transform_1, window_bounds = array<i64: 16, 128>}, {pipeline_mode = #tpu.pipeline_mode<synchronous>, transform_indices = @transform_2, window_bounds = array<i64: 1, 128>}, {pipeline_mode = #tpu.pipeline_mode<synchronous>, transform_indices = @transform_3, window_bounds = array<i64: 128, 4>}, {pipeline_mode = #tpu.pipeline_mode<synchronous>, transform_indices = @transform_4, window_bounds = array<i64: 1, 4>}, {transform_indices = @transform_5, window_bounds = array<i64: 1, 16, 4>}]} {
    %c0 = arith.constant 0 : index
    %c0_0 = arith.constant 0 : index
    %c0_1 = arith.constant 0 : index
    %0 = vector.load %arg2[%c0, %c0_0, %c0_1] : memref<1x16x16xf32, #tpu.memory_space<vmem>>, vector<1x16x16xf32>
    %1 = vector.shape_cast %0 : vector<1x16x16xf32> to vector<16x16xf32>
    %c0_2 = arith.constant 0 : index
    %c0_3 = arith.constant 0 : index
    %2 = vector.load %arg3[%c0_2, %c0_3] : memref<16x128xf32, #tpu.memory_space<vmem>>, vector<16x128xf32>
    %cst = arith.constant dense<0.000000e+00> : vector<16x128xf32>
    %3 = tpu.matmul %1, %2, %cst {dimension_numbers = #tpu.dot_dimension_numbers<[1], [0], [0], [1], [0, 0, 1, 1], [], []>} : vector<16x16xf32>, vector<16x128xf32>, vector<16x128xf32> -> vector<16x128xf32>
    %c0_4 = arith.constant 0 : index
    %c0_5 = arith.constant 0 : index
    %4 = vector.load %arg4[%c0_4, %c0_5] : memref<1x128xf32, #tpu.memory_space<vmem>>, vector<1x128xf32>
    %5 = vector.broadcast %4 : vector<1x128xf32> to vector<16x128xf32>
    %6 = arith.addf %3, %5 : vector<16x128xf32>
    %cst_6 = arith.constant 0.000000e+00 : f32
    %7 = vector.broadcast %cst_6 : f32 to vector<16x128xf32>
    %8 = arith.maximumf %6, %7 : vector<16x128xf32>
    %c0_7 = arith.constant 0 : index
    %c0_8 = arith.constant 0 : index
    %9 = vector.load %arg5[%c0_7, %c0_8] : memref<128x4xf32, #tpu.memory_space<vmem>>, vector<128x4xf32>
    %cst_9 = arith.constant dense<0.000000e+00> : vector<16x4xf32>
    %10 = tpu.matmul %8, %9, %cst_9 {dimension_numbers = #tpu.dot_dimension_numbers<[1], [0], [0], [1], [0, 0, 1, 1], [], []>} : vector<16x128xf32>, vector<128x4xf32>, vector<16x4xf32> -> vector<16x4xf32>
    %c0_10 = arith.constant 0 : index
    %c0_11 = arith.constant 0 : index
    %11 = vector.load %arg6[%c0_10, %c0_11] : memref<1x4xf32, #tpu.memory_space<vmem>>, vector<1x4xf32>
    %12 = vector.broadcast %11 : vector<1x4xf32> to vector<16x4xf32>
    %13 = arith.addf %10, %12 : vector<16x4xf32>
    %c0_12 = arith.constant 0 : index
    %c0_13 = arith.constant 0 : index
    %c0_14 = arith.constant 0 : index
    %14 = vector.load %arg7[%c0_12, %c0_13, %c0_14] : memref<1x16x4xf32, #tpu.memory_space<vmem>>, vector<1x16x4xf32>
    %15 = vector.shape_cast %14 : vector<1x16x4xf32> to vector<16x4xf32>
    %16 = vector.shape_cast %13 : vector<16x4xf32> to vector<1x16x4xf32>
    tpu.vector_store %arg7[%c0_12, %c0_13, %c0_14], %16 {strides = array<i32>} : memref<1x16x4xf32, #tpu.memory_space<vmem>>, vector<1x16x4xf32>,
    return
  }
  func.func @transform_0(%arg0: i32, %arg1: i32) -> (i32, i32, i32) {
    %c0_i32 = arith.constant 0 : i32
    %c0_i32_0 = arith.constant 0 : i32
    return %arg0, %arg1, %c0_i32 : i32, i32, i32
  }
  func.func @transform_1(%arg0: i32, %arg1: i32) -> (i32, i32) {
    %c0_i32 = arith.constant 0 : i32
    %c0_i32_0 = arith.constant 0 : i32
    %c0_i32_1 = arith.constant 0 : i32
    return %c0_i32, %c0_i32_0 : i32, i32
  }
  func.func @transform_2(%arg0: i32, %arg1: i32) -> (i32, i32) {
    %c0_i32 = arith.constant 0 : i32
    %c0_i32_0 = arith.constant 0 : i32
    %c0_i32_1 = arith.constant 0 : i32
    return %c0_i32, %c0_i32_0 : i32, i32
  }
  func.func @transform_3(%arg0: i32, %arg1: i32) -> (i32, i32) {
    %c0_i32 = arith.constant 0 : i32
    %c0_i32_0 = arith.constant 0 : i32
    %c0_i32_1 = arith.constant 0 : i32
    return %c0_i32, %c0_i32_0 : i32, i32
  }
  func.func @transform_4(%arg0: i32, %arg1: i32) -> (i32, i32) {
    %c0_i32 = arith.constant 0 : i32
    %c0_i32_0 = arith.constant 0 : i32
    %c0_i32_1 = arith.constant 0 : i32
    return %c0_i32, %c0_i32_0 : i32, i32
  }
  func.func @transform_5(%arg0: i32, %arg1: i32) -> (i32, i32, i32) {
    %c0_i32 = arith.constant 0 : i32
    %c0_i32_0 = arith.constant 0 : i32
    return %arg0, %arg1, %c0_i32 : i32, i32, i32
  }
}

</mosaic_0001>

<bundles_post_ra>
// kernel: graph_decoder_forward.1
= control target key start
LH: loop header
LB: loop body
LE: loop exit
PB: predicated region body
PF: predicated region fallthrough
CT: control target
= control target key end

     0   :  { %10 = vsyncpa [#allocation3], 0  ;;  %s800_s0 = inlined_call_operand.vmem [shape: f32[2,32,16], index: 0, kind: input, shape index: {}]   ;;  %s801_s1 = inlined_call_operand.vmem [shape: f32[16,128], index: 1, kind: input, shape index: {}]   ;;  %s802_s2 = inlined_call_operand.vmem [shape: f32[1,128], index: 2, kind: input, shape index: {}]   ;;  %s803_s3 = inlined_call_operand.vmem [shape: f32[128,4], index: 3, kind: input, shape index: {}]   ;;  %s804_s4 = inlined_call_operand.vmem [shape: f32[1,4], index: 4, kind: input, shape index: {}]   ;;  %s805_s5 = inlined_call_operand.hbm [shape: f32[2,16,4], index: 5, kind: output, shape index: {}]  }
   0x1   :  { %12 = vsyncpa [#allocation3 + $0x1], 0  ;;  %s641_s18 = smov 0   ;;  %s643_s19 = smov 0  }
   0x2   :  { %s645_s20 = smov 0   ;;  %s647_s21 = smov 0  }
   0x3   :  { %s649_s22 = smov 0   ;;  %s651_s23 = smov 0  }
   0x4 LB: > { %s437_s24 = sadd.s32 4294967295, %s607_s23   ;;  %s438_s25 = sadd.s32 4294967294, %s607_s23   ;;  %s607_s23 = sphi %s651_s23, %s18_s23   ;;  %s603_s22 = sphi %s649_s22, %s812_s22   ;;  %s599_s21 = sphi %s647_s21, %s811_s21   ;;  %s595_s20 = sphi %s645_s20, %s810_s20   ;;  %s591_s19 = sphi %s643_s19, %s809_s19   ;;  %s587_s18 = sphi %s641_s18, %s808_s18  }
   0x5   : > { %s30_s26 = sadd.s32 1, %s603_s22  ;;  %s151_s27 = sadd.s32 1, %s595_s20 }
   0x6   : > { %p32_p0 = scmp.ge.s32.totalorder %s30_s26, 2  ;;  %p161_p1 = scmp.ne.s32.totalorder %s595_s20, %s591_s19 }
   0x7   : > { %p162_p2 = scmp.eq.s32.totalorder %s437_s24, 1  ;;  %p167_p3 = scmp.ne.s32.totalorder %s591_s19, %s587_s18 }
   0x8   : > { %s814_s26 = smov (%p32_p0, %s30_s26), 0  ;;  %p168_p5 = scmp.eq.s32.totalorder %s438_s25, 1 }
   0x9   : > { %p681_p4 = por %p162_p2, %p161_p1  ;;  %s146_s29 = ssub.s32 %s603_s22, %s814_s26 }
   0xa   : > { %p441_p6 = scmp.ge.s32.totalorder %s607_s23, 1  ;;  %p149_p7 = scmp.eq.s32.totalorder %s146_s29, 0 }
   0xb   : > { %p688_p8 = por %p168_p5, %p167_p3  ;;  %p211_p9 = scmp.lt.s32.totalorder %s607_s23, 3 }
   0xc   : > { %s694_s6 = scalar_select %p149_p7, %s595_s20, %s151_s27  }
   0xd   : > { %p212_p10 = pnand %p441_p6, %p211_p9 }
   0xe   : > { %p244_p11 = scmp.lt.s32.totalorder (!%p212_p10), %s599_s21, 1  ;;  %s240_s27 = sand.u32 (!%p212_p10), 1, %s591_s19  }
   0xf   : > { %215 = sbr.rel (%p212_p10) target bundleno = 301 (0x12d), region = 40  ;;  %s442_s29 = sshll.u32 (!%p212_p10), %s240_s27, 4 }
  0x10   : > { %s242_s9 = scalar_lea.vmem (!%p212_p10), [#allocation2], %s442_s29  ;;  %s453_s10 = sshll.u32 (!%p212_p10), %s599_s21, 4 }
  0x11   : > { %s354_s13 = scalar_lea.hbm (!%p212_p10), %s805_s5, %s453_s10  ;;  %s355_s14 = sshll.u32 (!%p212_p10), %s242_s9, 4  ;;  %s356_s14 = int_to_ptr.vmem [resolvable:$true] %s355_s14 }
  0x12   : > { %s341_s16 = scalar_lea.sflag (!%p212_p10), [#allocation3], %s240_s27  ;;  %s549_s29 = scalar_lea.hbm (!%p212_p10), %s805_s5, 32 }
  0x14   : > { %v257_v0 = vld [vmem:[%s801_s1 + $0x8] sm:$0xff]  ;;  %v256_v1 = vld [vmem:[%s801_s1] sm:$0xff]  ;;  %v309_v2 = vld [vmem:[%s803_s3 + $0x78] sm:$0xff]  ;;  %s245_s15 = scalar_select %p244_p11, %s599_s21, 1  ;;  %vm262_vm0 = vcmask 130048   ;;  %vm337_vm1 = vcmask 31744  }
  0x15   : > { %283 = vmatpush.msra.mxu0 %v257_v0  ;;  %314 = vmatpush.msra.mxu1 %v309_v2  ;;  %v308_v3 = vld [vmem:[%s803_s3 + $0x70] sm:$0xff]  ;;  %v307_v4 = vld [vmem:[%s803_s3 + $0x68] sm:$0xff]  ;;  %v306_v5 = vld [vmem:[%s803_s3 + $0x60] sm:$0xff] }
  0x16   : > { %454 = vmatpush.msra.mxu2 %v309_v2  ;;  %s452_s24 = sshll.u32 %s245_s15, 5  ;;  %v305_v7 = vld [vmem:[%s803_s3 + $0x58] sm:$0xff]  ;;  %v304_v8 = vld [vmem:[%s803_s3 + $0x50] sm:$0xff]  ;;  %v303_v9 = vld [vmem:[%s803_s3 + $0x48] sm:$0xff]  ;;  %s357_s15 = sshll.u32 %s354_s13, 4  ;;  %s358_s15 = int_to_ptr.hbm [resolvable:$true] %s357_s15 }
  0x17   : > { %284 = vmatpush.msra.mxu0 %v256_v1  ;;  %315 = vmatpush.msra.mxu1 %v308_v3  ;;  %s251_s8 = scalar_lea.vmem %s800_s0, %s452_s24  ;;  %v302_v11 = vld [vmem:[%s803_s3 + $0x40] sm:$0xff]  ;;  %v301_v12 = vld [vmem:[%s803_s3 + $0x38] sm:$0xff]  ;;  %v300_v13 = vld [vmem:[%s803_s3 + $0x30] sm:$0xff]  ;;  %s543_s17 = sshra.s32 %s358_s15, 4  ;;  %s544_s17 = int_to_ptr.hbm [resolvable:$true] %s543_s17 }
  0x18   : > { %455 = vmatpush.msra.mxu2 %v308_v3  ;;  %v254_v6 = vld [vmem:[%s251_s8] sm:$0xff]  ;;  %v255_v10 = vld [vmem:[%s251_s8 + $0x8] sm:$0xff]  ;;  %v297_v16 = vld [vmem:[%s803_s3 + $0x18] sm:$0xff]  ;;  %s545_s24 = scalar_lea.hbm %s544_s17, 16  ;;  %p550_p1 = scmp.lt.s32.totalorder %s544_s17, %s805_s5 }
  0x19   : > { %316 = vmatpush.msra.mxu1 %v307_v4  ;;  %445 = vmatmul.msk.f32.vlgmr.msra.gmra.mxu0 %vm262_vm0, %v254_v6  ;;  %v299_v14 = vld [vmem:[%s803_s3 + $0x28] sm:$0xff]  ;;  %v298_v15 = vld [vmem:[%s803_s3 + $0x20] sm:$0xff]  ;;  %v296_v17 = vld [vmem:[%s803_s3 + $0x10] sm:$0xff]  ;;  %p546_p12 = scmp.ne.s32.totalorder %s544_s17, %s545_s24  ;;  %p551_p2 = scmp.lt.s32.totalorder %s549_s29, %s545_s24 }
  0x1a   : > { %456 = vmatpush.msra.mxu2 %v307_v4  ;;  %v295_v18 = vld [vmem:[%s803_s3 + $0x8] sm:$0xff]  ;;  %v294_v19 = vld [vmem:[%s803_s3] sm:$0xff] }
  0x1b   : > { %317 = vmatpush.msra.mxu1 %v306_v5  ;;  %v527_v20 = vld [vmem:[%s802_s2] ss:$0 sm:$0xff]  ;;  %p547_p13 = pnand %p546_p12, %p681_p4  ;;  %p552_p3 = por %p551_p2, %p550_p1 }
  0x1c   : > { %457 = vmatpush.msra.mxu2 %v306_v5  ;;  %v528_v27 = vld [vmem:[%s804_s4] ss:$0 sm:$0xff] }
  0x1d   : > { %318 = vmatpush.msra.mxu1 %v305_v7  ;;  %p548_p0 = pneg %p547_p13 }
  0x1e   : > { %458 = vmatpush.msra.mxu2 %v305_v7 }
  0x1f   : > { %319 = vmatpush.msra.mxu1 %v304_v8  ;;  %p553_p5 = pnand %p552_p3, %p548_p0 }
  0x20   : > { %459 = vmatpush.msra.mxu2 %v304_v8 }
  0x21   : > { %320 = vmatpush.msra.mxu1 %v303_v9  ;;  %446 = vmatmul.msk.f32.gmra.mxu0 %vm262_vm0, %v255_v10 }
  0x22   : > { %460 = vmatpush.msra.mxu2 %v303_v9 }
  0x23   : > { %321 = vmatpush.msra.mxu1 %v302_v11 }
  0x24   : > { %461 = vmatpush.msra.mxu2 %v302_v11 }
  0x25   : > { %322 = vmatpush.msra.mxu1 %v301_v12 }
  0x26   : > { %462 = vmatpush.msra.mxu2 %v301_v12 }
  0x27   : > { %323 = vmatpush.msra.mxu1 %v300_v13 }
  0x28   : > { %463 = vmatpush.msra.mxu2 %v300_v13 }
  0x29   : > { %324 = vmatpush.msra.mxu1 %v299_v14 }
  0x2a   : > { %464 = vmatpush.msra.mxu2 %v299_v14 }
  0x2b   : > { %325 = vmatpush.msra.mxu1 %v298_v15 }
  0x2c   : > { %465 = vmatpush.msra.mxu2 %v298_v15 }
  0x2d   : > { %326 = vmatpush.msra.mxu1 %v297_v16 }
  0x2e   : > { %466 = vmatpush.msra.mxu2 %v297_v16 }
  0x2f   : > { %327 = vmatpush.msra.mxu1 %v296_v17 }
  0x30   : > { %467 = vmatpush.msra.mxu2 %v296_v17 }
  0x31   : > { %328 = vmatpush.msra.mxu1 %v295_v18 }
  0x32   : > { %468 = vmatpush.msra.mxu2 %v295_v18 }
  0x33   : > { %329 = vmatpush.msra.mxu1 %v294_v19 }
  0x34   : > { %469 = vmatpush.msra.mxu2 %v294_v19 }
  0x96   : > { %v286_v21 = vpop.f32.mrf.mxu0 }
  0x97   : > { %v287_v22 = vadd.f32 %v527_v20, %v286_v21 }
  0x99   : > { %v292_v23 = vmax.f32 %v287_v22, 0.0 }
  0x9b   : > { %330 = vmatmul.f32.vlgmr.msra.gmra.mxu1 %v292_v23 }
  0x9e   : > { %v289_v24 = vpop.f32.mrf.mxu0 }
  0x9f   : > { %v290_v25 = vadd.f32 %v527_v20, %v289_v24 }
  0xa1   : > { %v293_v26 = vmax.f32 %v290_v25, 0.0 }
  0xa3   : > { %333 = vmatmul.f32.vlgmr.msra.gmra.mxu2 %v293_v26 }
 0x118   : > { %v331_v28 = vpop.f32.mrf.mxu1 }
 0x119   : > { %v332_v29 = vadd.f32 %v528_v27, %v331_v28 }
 0x11b   : > { %338 = vst.msk [vmem:[%s242_s9] sm:$0xff] %vm337_vm1, %v332_v29 }
 0x126   : > { %v334_v30 = vpop.f32.mrf.mxu2 }
 0x127   : > { %v335_v31 = vadd.f32 %v528_v27, %v334_v30 }
 0x129   : > { %339 = vst.msk [vmem:[%s242_s9 + $0x8] sm:$0xff] %vm337_vm1, %v335_v31 }
 0x12a   : > { %556 = shalt.err (!%p553_p5)
}
 0x12b   : > { %s609_s27 = smov 128   ;;  %s610_s9 = smov 8  }
 0x12c   : > { %470 = dma.vmem_to_hbm [thread:$0]  (%p681_p4), %s356_s14, 256, %s358_s15, %s341_s16, %s609_s27, %s609_s27, %s610_s9  }
 0x12d PF: > { %p476_p6 = scmp.ge.s32.totalorder %s607_s23, 2  ;;  %s372_s10 = sand.u32 1, %s587_s18  }
 0x12e   : > { %s373_s11 = scalar_lea.sflag [#allocation3], %s372_s10 }
 0x12f   : > { %p473_p7 = pnand %p476_p6, %p688_p8 }
 0x131   : > { %p474_p9 = pneg %p473_p7 }
 0x133   : > { %582 = dma.done.wait (%p474_p9), %s373_s11, 256  }
 0x134   : > { %584 = vsyncadd (%p474_p9), %s373_s11, 4294967040  ;;  %s18_s23 = sadd.s32 1, %s607_s23   ;;  %s808_s18 = smov %s591_s19 }
 0x135   : > { %p15_p10 = scmp.ge.s32.totalorder %s18_s23, 4   ;;  %s809_s19 = smov %s595_s20 }
 0x136   : > { %s810_s20 = smov %s694_s6  ;;  %s811_s21 = smov %s603_s22 }
 0x137   : > { %s812_s22 = smov %s814_s26  ;;  %17 = sbr.rel (!%p15_p10) target bundleno = 4 (0x4), region = 75 }
 0x13c   :  { %379 = vsyncpa [#allocation3], 1 }
 0x13d   :  { %381 = vsyncpa [#allocation3 + $0x1], 1 }

// kernel: graph_decoder_forward.1
= control target key start
LH: loop header
LB: loop body
LE: loop exit
PB: predicated region body
PF: predicated region fallthrough
CT: control target
= control target key end

     0   :  { %10 = vsyncpa [#allocation3], 0  ;;  %s800_s0 = inlined_call_operand.vmem [shape: f32[2,32,16], index: 0, kind: input, shape index: {}]   ;;  %s801_s1 = inlined_call_operand.vmem [shape: f32[16,128], index: 1, kind: input, shape index: {}]   ;;  %s802_s2 = inlined_call_operand.vmem [shape: f32[1,128], index: 2, kind: input, shape index: {}]   ;;  %s803_s3 = inlined_call_operand.vmem [shape: f32[128,4], index: 3, kind: input, shape index: {}]   ;;  %s804_s4 = inlined_call_operand.vmem [shape: f32[1,4], index: 4, kind: input, shape index: {}]   ;;  %s805_s5 = inlined_call_operand.hbm [shape: f32[2,16,4], index: 5, kind: output, shape index: {}]  }
   0x1   :  { %12 = vsyncpa [#allocation3 + $0x1], 0  ;;  %s641_s18 = smov 0   ;;  %s643_s19 = smov 0  }
   0x2   :  { %s645_s20 = smov 0   ;;  %s647_s21 = smov 0  }
   0x3   :  { %s649_s22 = smov 0   ;;  %s651_s23 = smov 0  }
   0x4 LB: > { %s437_s24 = sadd.s32 4294967295, %s607_s23   ;;  %s438_s25 = sadd.s32 4294967294, %s607_s23   ;;  %s607_s23 = sphi %s651_s23, %s18_s23   ;;  %s603_s22 = sphi %s649_s22, %s812_s22   ;;  %s599_s21 = sphi %s647_s21, %s811_s21   ;;  %s595_s20 = sphi %s645_s20, %s810_s20   ;;  %s591_s19 = sphi %s643_s19, %s809_s19   ;;  %s587_s18 = sphi %s641_s18, %s808_s18  }
   0x5   : > { %s30_s26 = sadd.s32 1, %s603_s22  ;;  %s151_s27 = sadd.s32 1, %s595_s20 }
   0x6   : > { %p32_p0 = scmp.ge.s32.totalorder %s30_s26, 2  ;;  %p161_p1 = scmp.ne.s32.totalorder %s595_s20, %s591_s19 }
   0x7   : > { %p162_p2 = scmp.eq.s32.totalorder %s437_s24, 1  ;;  %p167_p3 = scmp.ne.s32.totalorder %s591_s19, %s587_s18 }
   0x8   : > { %s814_s26 = smov (%p32_p0, %s30_s26), 0  ;;  %p168_p5 = scmp.eq.s32.totalorder %s438_s25, 1 }
   0x9   : > { %p681_p4 = por %p162_p2, %p161_p1  ;;  %s146_s29 = ssub.s32 %s603_s22, %s814_s26 }
   0xa   : > { %p441_p6 = scmp.ge.s32.totalorder %s607_s23, 1  ;;  %p149_p7 = scmp.eq.s32.totalorder %s146_s29, 0 }
   0xb   : > { %p688_p8 = por %p168_p5, %p167_p3  ;;  %p211_p9 = scmp.lt.s32.totalorder %s607_s23, 3 }
   0xc   : > { %s694_s6 = scalar_select %p149_p7, %s595_s20, %s151_s27  }
   0xd   : > { %p212_p10 = pnand %p441_p6, %p211_p9 }
   0xe   : > { %p244_p11 = scmp.lt.s32.totalorder (!%p212_p10), %s599_s21, 1  ;;  %s240_s27 = sand.u32 (!%p212_p10), 1, %s591_s19  }
   0xf   : > { %215 = sbr.rel (%p212_p10) target bundleno = 301 (0x12d), region = 40  ;;  %s442_s29 = sshll.u32 (!%p212_p10), %s240_s27, 4 }
  0x10   : > { %s242_s9 = scalar_lea.vmem (!%p212_p10), [#allocation2], %s442_s29  ;;  %s453_s10 = sshll.u32 (!%p212_p10), %s599_s21, 4 }
  0x11   : > { %s354_s13 = scalar_lea.hbm (!%p212_p10), %s805_s5, %s453_s10  ;;  %s355_s14 = sshll.u32 (!%p212_p10), %s242_s9, 4  ;;  %s356_s14 = int_to_ptr.vmem [resolvable:$true] %s355_s14 }
  0x12   : > { %s341_s16 = scalar_lea.sflag (!%p212_p10), [#allocation3], %s240_s27  ;;  %s549_s29 = scalar_lea.hbm (!%p212_p10), %s805_s5, 32 }
  0x14   : > { %v257_v0 = vld [vmem:[%s801_s1 + $0x8] sm:$0xff]  ;;  %v256_v1 = vld [vmem:[%s801_s1] sm:$0xff]  ;;  %v309_v2 = vld [vmem:[%s803_s3 + $0x78] sm:$0xff]  ;;  %s245_s15 = scalar_select %p244_p11, %s599_s21, 1  ;;  %vm262_vm0 = vcmask 130048   ;;  %vm337_vm1 = vcmask 31744  }
  0x15   : > { %283 = vmatpush.msra.mxu0 %v257_v0  ;;  %314 = vmatpush.msra.mxu1 %v309_v2  ;;  %v308_v3 = vld [vmem:[%s803_s3 + $0x70] sm:$0xff]  ;;  %v307_v4 = vld [vmem:[%s803_s3 + $0x68] sm:$0xff]  ;;  %v306_v5 = vld [vmem:[%s803_s3 + $0x60] sm:$0xff] }
  0x16   : > { %454 = vmatpush.msra.mxu2 %v309_v2  ;;  %s452_s24 = sshll.u32 %s245_s15, 5  ;;  %v305_v7 = vld [vmem:[%s803_s3 + $0x58] sm:$0xff]  ;;  %v304_v8 = vld [vmem:[%s803_s3 + $0x50] sm:$0xff]  ;;  %v303_v9 = vld [vmem:[%s803_s3 + $0x48] sm:$0xff]  ;;  %s357_s15 = sshll.u32 %s354_s13, 4  ;;  %s358_s15 = int_to_ptr.hbm [resolvable:$true] %s357_s15 }
  0x17   : > { %284 = vmatpush.msra.mxu0 %v256_v1  ;;  %315 = vmatpush.msra.mxu1 %v308_v3  ;;  %s251_s8 = scalar_lea.vmem %s800_s0, %s452_s24  ;;  %v302_v11 = vld [vmem:[%s803_s3 + $0x40] sm:$0xff]  ;;  %v301_v12 = vld [vmem:[%s803_s3 + $0x38] sm:$0xff]  ;;  %v300_v13 = vld [vmem:[%s803_s3 + $0x30] sm:$0xff]  ;;  %s543_s17 = sshra.s32 %s358_s15, 4  ;;  %s544_s17 = int_to_ptr.hbm [resolvable:$true] %s543_s17 }
  0x18   : > { %455 = vmatpush.msra.mxu2 %v308_v3  ;;  %v254_v6 = vld [vmem:[%s251_s8] sm:$0xff]  ;;  %v255_v10 = vld [vmem:[%s251_s8 + $0x8] sm:$0xff]  ;;  %v297_v16 = vld [vmem:[%s803_s3 + $0x18] sm:$0xff]  ;;  %s545_s24 = scalar_lea.hbm %s544_s17, 16  ;;  %p550_p1 = scmp.lt.s32.totalorder %s544_s17, %s805_s5 }
  0x19   : > { %316 = vmatpush.msra.mxu1 %v307_v4  ;;  %445 = vmatmul.msk.f32.vlgmr.msra.gmra.mxu0 %vm262_vm0, %v254_v6  ;;  %v299_v14 = vld [vmem:[%s803_s3 + $0x28] sm:$0xff]  ;;  %v298_v15 = vld [vmem:[%s803_s3 + $0x20] sm:$0xff]  ;;  %v296_v17 = vld [vmem:[%s803_s3 + $0x10] sm:$0xff]  ;;  %p546_p12 = scmp.ne.s32.totalorder %s544_s17, %s545_s24  ;;  %p551_p2 = scmp.lt.s32.totalorder %s549_s29, %s545_s24 }
  0x1a   : > { %456 = vmatpush.msra.mxu2 %v307_v4  ;;  %v295_v18 = vld [vmem:[%s803_s3 + $0x8] sm:$0xff]  ;;  %v294_v19 = vld [vmem:[%s803_s3] sm:$0xff] }
  0x1b   : > { %317 = vmatpush.msra.mxu1 %v306_v5  ;;  %v527_v20 = vld [vmem:[%s802_s2] ss:$0 sm:$0xff]  ;;  %p547_p13 = pnand %p546_p12, %p681_p4  ;;  %p552_p3 = por %p551_p2, %p550_p1 }
  0x1c   : > { %457 = vmatpush.msra.mxu2 %v306_v5  ;;  %v528_v27 = vld [vmem:[%s804_s4] ss:$0 sm:$0xff] }
  0x1d   : > { %318 = vmatpush.msra.mxu1 %v305_v7  ;;  %p548_p0 = pneg %p547_p13 }
  0x1e   : > { %458 = vmatpush.msra.mxu2 %v305_v7 }
  0x1f   : > { %319 = vmatpush.msra.mxu1 %v304_v8  ;;  %p553_p5 = pnand %p552_p3, %p548_p0 }
  0x20   : > { %459 = vmatpush.msra.mxu2 %v304_v8 }
  0x21   : > { %320 = vmatpush.msra.mxu1 %v303_v9  ;;  %446 = vmatmul.msk.f32.gmra.mxu0 %vm262_vm0, %v255_v10 }
  0x22   : > { %460 = vmatpush.msra.mxu2 %v303_v9 }
  0x23   : > { %321 = vmatpush.msra.mxu1 %v302_v11 }
  0x24   : > { %461 = vmatpush.msra.mxu2 %v302_v11 }
  0x25   : > { %322 = vmatpush.msra.mxu1 %v301_v12 }
  0x26   : > { %462 = vmatpush.msra.mxu2 %v301_v12 }
  0x27   : > { %323 = vmatpush.msra.mxu1 %v300_v13 }
  0x28   : > { %463 = vmatpush.msra.mxu2 %v300_v13 }
  0x29   : > { %324 = vmatpush.msra.mxu1 %v299_v14 }
  0x2a   : > { %464 = vmatpush.msra.mxu2 %v299_v14 }
  0x2b   : > { %325 = vmatpush.msra.mxu1 %v298_v15 }
  0x2c   : > { %465 = vmatpush.msra.mxu2 %v298_v15 }
  0x2d   : > { %326 = vmatpush.msra.mxu1 %v297_v16 }
  0x2e   : > { %466 = vmatpush.msra.mxu2 %v297_v16 }
  0x2f   : > { %327 = vmatpush.msra.mxu1 %v296_v17 }
  0x30   : > { %467 = vmatpush.msra.mxu2 %v296_v17 }
  0x31   : > { %328 = vmatpush.msra.mxu1 %v295_v18 }
  0x32   : > { %468 = vmatpush.msra.mxu2 %v295_v18 }
  0x33   : > { %329 = vmatpush.msra.mxu1 %v294_v19 }
  0x34   : > { %469 = vmatpush.msra.mxu2 %v294_v19 }
  0x96   : > { %v286_v21 = vpop.f32.mrf.mxu0 }
  0x97   : > { %v287_v22 = vadd.f32 %v527_v20, %v286_v21 }
  0x99   : > { %v292_v23 = vmax.f32 %v287_v22, 0.0 }
  0x9b   : > { %330 = vmatmul.f32.vlgmr.msra.gmra.mxu1 %v292_v23 }
  0x9e   : > { %v289_v24 = vpop.f32.mrf.mxu0 }
  0x9f   : > { %v290_v25 = vadd.f32 %v527_v20, %v289_v24 }
  0xa1   : > { %v293_v26 = vmax.f32 %v290_v25, 0.0 }
  0xa3   : > { %333 = vmatmul.f32.vlgmr.msra.gmra.mxu2 %v293_v26 }
 0x118   : > { %v331_v28 = vpop.f32.mrf.mxu1 }
 0x119   : > { %v332_v29 = vadd.f32 %v528_v27, %v331_v28 }
 0x11b   : > { %338 = vst.msk [vmem:[%s242_s9] sm:$0xff] %vm337_vm1, %v332_v29 }
 0x126   : > { %v334_v30 = vpop.f32.mrf.mxu2 }
 0x127   : > { %v335_v31 = vadd.f32 %v528_v27, %v334_v30 }
 0x129   : > { %339 = vst.msk [vmem:[%s242_s9 + $0x8] sm:$0xff] %vm337_vm1, %v335_v31 }
 0x12a   : > { %556 = shalt.err (!%p553_p5)
}
 0x12b   : > { %s609_s27 = smov 128   ;;  %s610_s9 = smov 8  }
 0x12c   : > { %470 = dma.vmem_to_hbm [thread:$0]  (%p681_p4), %s356_s14, 256, %s358_s15, %s341_s16, %s609_s27, %s609_s27, %s610_s9  }
 0x12d PF: > { %p476_p6 = scmp.ge.s32.totalorder %s607_s23, 2  ;;  %s372_s10 = sand.u32 1, %s587_s18  }
 0x12e   : > { %s373_s11 = scalar_lea.sflag [#allocation3], %s372_s10 }
 0x12f   : > { %p473_p7 = pnand %p476_p6, %p688_p8 }
 0x131   : > { %p474_p9 = pneg %p473_p7 }
 0x133   : > { %582 = dma.done.wait (%p474_p9), %s373_s11, 256  }
 0x134   : > { %584 = vsyncadd (%p474_p9), %s373_s11, 4294967040  ;;  %s18_s23 = sadd.s32 1, %s607_s23   ;;  %s808_s18 = smov %s591_s19 }
 0x135   : > { %p15_p10 = scmp.ge.s32.totalorder %s18_s23, 4   ;;  %s809_s19 = smov %s595_s20 }
 0x136   : > { %s810_s20 = smov %s694_s6  ;;  %s811_s21 = smov %s603_s22 }
 0x137   : > { %s812_s22 = smov %s814_s26  ;;  %17 = sbr.rel (!%p15_p10) target bundleno = 4 (0x4), region = 75 }
 0x13c   :  { %379 = vsyncpa [#allocation3], 1 }
 0x13d   :  { %381 = vsyncpa [#allocation3 + $0x1], 1 }

</bundles_post_ra>
